<compile_context>
chip_gen: v7x
topology: tpu7x:2x2x1
jax: 0.10.0
libtpu: 0.0.40
codegen_flags: <defaults>
</compile_context>

<pallas_src>
import functools

import jax
import jax.numpy as jnp
from jax.experimental import pallas as pl
from jax.experimental.pallas import tpu as pltpu


def _round_up(x, m):
    return (x + m - 1) // m * m


def _vmem_limit_bytes():
    # Stay well under physical VMEM: v7x has 64 MiB (keep <= ~48 MiB); v5e/v6e
    # have 128 MiB but small scoped defaults (16/32 MiB), so raise explicitly.
    try:
        cap = pltpu.get_tpu_info().vmem_capacity_bytes
    except Exception:
        cap = 64 * 1024 * 1024
    return int(min(cap * 3 // 4, 96 * 1024 * 1024))


def _choose_tiles(n):
    """Aggregation tiling: ~1 MiB bf16 A blocks, >=2 row tiles when possible."""
    tk = min(1024, _round_up(n, 128))          # reduction (column) tile
    n_pad = _round_up(n, tk)                   # square padding; tk | n_pad
    tm = n_pad                                 # fallback: single row tile
    for cand in (512, 448, 384, 320, 256, 192, 128, 64, 32, 16, 8):
        if cand <= n_pad and n_pad % cand == 0 and n_pad // cand >= 2:
            tm = cand                          # >=2 row tiles -> v7x dual-TC
            break
    return tm, tk, n_pad


# ------------------------- Pallas kernels -------------------------

def _xw_kernel(x_ref, w_ref, o_ref):
    # Feature transform XW = X @ W; contraction dim is the TRUE f_in (no 128
    # padding), f32 accumulation on the MXU, bf16 output (feeds aggregation).
    o_ref[...] = jnp.dot(
        x_ref[...], w_ref[...], preferred_element_type=jnp.float32
    ).astype(o_ref.dtype)


def _agg_fused_kernel(a_ref, xw_ref, b_ref, w2_ref, o_ref, acc_ref, *, tk):
    # acc[i] = b1 + sum_k A[i,k] @ XW1[k]  ;  o[i] = relu(acc[i]) @ W2  (bf16)
    k = pl.program_id(1)

    @pl.when(k == 0)
    def _():
        acc_ref[...] = jnp.broadcast_to(b_ref[...], acc_ref.shape)

    off = pl.multiple_of(k * tk, tk)
    acc_ref[...] += jnp.dot(
        a_ref[...], xw_ref[pl.ds(off, tk), :],
        preferred_element_type=jnp.float32)

    @pl.when(k == pl.num_programs(1) - 1)
    def _():
        # conv1 epilogue (relu; eval-mode dropout == identity) fused with
        # conv2's feature transform: emit XW2 directly in bf16.
        h = jnp.maximum(acc_ref[...], 0.0).astype(jnp.bfloat16)
        o_ref[...] = jnp.dot(
            h, w2_ref[...], preferred_element_type=jnp.float32
        ).astype(o_ref.dtype)


def _agg_out_kernel(a_ref, xw_ref, b_ref, o_ref, *, tk):
    # out[i] = b2 + sum_k A[i,k] @ XW2[k]; the f32 output block is resident
    # across k (index_map ignores k) so accumulate into it directly.
    k = pl.program_id(1)

    @pl.when(k == 0)
    def _():
        o_ref[...] = jnp.broadcast_to(b_ref[...], o_ref.shape)

    off = pl.multiple_of(k * tk, tk)
    o_ref[...] += jnp.dot(
        a_ref[...], xw_ref[pl.ds(off, tk), :],
        preferred_element_type=jnp.float32)


# ------------------------- Glue (plain JAX) -------------------------

def gcn_normalize(edge_index, edge_weight, num_nodes):
    """Dense D^{-1/2} (A + I) D^{-1/2}, matching PyG's gcn_norm."""
    src = edge_index[0]
    dst = edge_index[1]
    a = jnp.zeros((num_nodes, num_nodes), jnp.float32)
    a = a.at[dst, src].add(edge_weight.astype(jnp.float32))   # A[target, source]
    a = a + jnp.eye(num_nodes, dtype=jnp.float32)              # self-loops
    deg = a.sum(axis=1)
    dinv = jnp.where(deg > 0, 1.0 / jnp.sqrt(deg), 0.0)
    return a * dinv[:, None] * dinv[None, :]


def glorot(key, shape):
    fan_in, fan_out = shape
    limit = jnp.sqrt(6.0 / (fan_in + fan_out))
    return jax.random.uniform(key, shape, jnp.float32, -limit, limit)


# ------------------------- Forward -------------------------

def graph_gcn_forward(x, edge_index, edge_weight, params):
    n, f_in = x.shape
    hidden = params["w1"].shape[1]
    n_cls = params["w2"].shape[1]
    f_h = _round_up(hidden, 128)        # lane-dense hidden width
    f_o = _round_up(n_cls, 128)         # lane-dense class width

    tm, tk, n_pad = _choose_tiles(n)
    vmem_limit = _vmem_limit_bytes()

    # ---- plain-JAX glue: normalized dense adjacency, padded operands ----
    a_hat = gcn_normalize(edge_index, edge_weight, n)
    a_pad = (jnp.zeros((n_pad, n_pad), jnp.float32)
             .at[:n, :n].set(a_hat)).astype(jnp.bfloat16)       # bf16 stream
    x_pad = jnp.zeros((n_pad, f_in), jnp.float32).at[:n, :].set(x)

    w1_pad = jnp.zeros((f_in, f_h), jnp.float32).at[:, :hidden].set(params["w1"])
    b1_pad = jnp.zeros((1, f_h), jnp.float32).at[:, :hidden].set(
        params["b1"].reshape(1, hidden))
    w2_pad = (jnp.zeros((f_h, f_o), jnp.float32)
              .at[:hidden, :n_cls].set(params["w2"])).astype(jnp.bfloat16)
    b2_pad = jnp.zeros((1, f_o), jnp.float32).at[:, :n_cls].set(
        params["b2"].reshape(1, n_cls))

    # ---- 1) XW1 = X @ W1 (hoisted; computed once; bf16 out) ----
    xw1 = pl.pallas_call(
        _xw_kernel,
        out_shape=jax.ShapeDtypeStruct((n_pad, f_h), jnp.bfloat16),
        grid=(n_pad // tm,),
        in_specs=[
            pl.BlockSpec((tm, f_in), lambda i: (i, 0)),     # true f_in width
            pl.BlockSpec((f_in, f_h), lambda i: (0, 0)),
        ],
        out_specs=pl.BlockSpec((tm, f_h), lambda i: (i, 0)),
        compiler_params=pltpu.CompilerParams(
            dimension_semantics=("parallel",),
            vmem_limit_bytes=vmem_limit),
    )(x_pad, w1_pad)

    agg_cost = pl.CostEstimate(
        flops=int(2 * n_pad * n_pad * f_h),
        transcendentals=0,
        bytes_accessed=int(n_pad * n_pad * 2        # A_hat (bf16), dominant
                           + n_pad * f_h * 2        # resident XW (bf16), once
                           + n_pad * f_o * 4),      # output
    )
    grid = (n_pad // tm, n_pad // tk)
    dimsem = ("parallel", "arbitrary")

    # ---- 2) fused: XW2 = relu(A_hat @ XW1 + b1) @ W2 (bf16 out) ----
    xw2 = pl.pallas_call(
        functools.partial(_agg_fused_kernel, tk=tk),
        out_shape=jax.ShapeDtypeStruct((n_pad, f_o), jnp.bfloat16),
        grid=grid,
        in_specs=[
            pl.BlockSpec((tm, tk), lambda i, k: (i, k)),        # A_hat tile
            pl.BlockSpec((n_pad, f_h), lambda i, k: (0, 0)),    # XW1 resident
            pl.BlockSpec((1, f_h), lambda i, k: (0, 0)),        # b1
            pl.BlockSpec((f_h, f_o), lambda i, k: (0, 0)),      # W2
        ],
        out_specs=pl.BlockSpec((tm, f_o), lambda i, k: (i, 0)),
        scratch_shapes=[pltpu.VMEM((tm, f_h), jnp.float32)],
        compiler_params=pltpu.CompilerParams(
            dimension_semantics=dimsem, vmem_limit_bytes=vmem_limit),
        cost_estimate=agg_cost,
    )(a_pad, xw1, b1_pad, w2_pad)
    # F.dropout(p=0.5, training=False) => identity in eval mode.

    # ---- 3) conv2 aggregation: out = A_hat @ XW2 + b2 (f32) ----
    out_pad = pl.pallas_call(
        functools.partial(_agg_out_kernel, tk=tk),
        out_shape=jax.ShapeDtypeStruct((n_pad, f_o), jnp.float32),
        grid=grid,
        in_specs=[
            pl.BlockSpec((tm, tk), lambda i, k: (i, k)),        # A_hat tile
            pl.BlockSpec((n_pad, f_o), lambda i, k: (0, 0)),    # XW2 resident
            pl.BlockSpec((1, f_o), lambda i, k: (0, 0)),        # b2
        ],
        out_specs=pl.BlockSpec((tm, f_o), lambda i, k: (i, 0)),
        compiler_params=pltpu.CompilerParams(
            dimension_semantics=dimsem, vmem_limit_bytes=vmem_limit),
        cost_estimate=agg_cost,
    )(a_pad, xw2, b2_pad)

    return out_pad[:n, :n_cls]


def reference_forward(x, edge_index, edge_weight, params):
    n = x.shape[0]
    a_hat = gcn_normalize(edge_index, edge_weight, n)
    h = jnp.maximum(a_hat @ (x @ params["w1"]) + params["b1"], 0.0)
    return a_hat @ (h @ params["w2"]) + params["b2"]


# ------------------------- Demo -------------------------

if __name__ == "__main__":
    key = jax.random.PRNGKey(0)
    k_x, k_e, k_w, k_w1, k_w2, k_b1, k_b2 = jax.random.split(key, 7)

    num_nodes = 16
    num_features = 8
    hidden = 32
    num_classes = 2
    num_edges = 32

    x = jax.random.normal(k_x, (num_nodes, num_features), jnp.float32)
    edge_index = jax.random.randint(k_e, (2, num_edges), 0, num_nodes,
                                    dtype=jnp.int32)
    edge_weight = jax.random.uniform(k_w, (num_edges,), jnp.float32, 0.1, 1.0)

    params = {
        "w1": glorot(k_w1, (num_features, hidden)),
        "b1": 0.1 * jax.random.normal(k_b1, (1, hidden), jnp.float32),
        "w2": glorot(k_w2, (hidden, num_classes)),
        "b2": 0.1 * jax.random.normal(k_b2, (1, num_classes), jnp.float32),
    }

    out = graph_gcn_forward(x, edge_index, edge_weight, params)
    jax.block_until_ready(out)
    assert out.shape == (num_nodes, num_classes)

    ref = reference_forward(x, edge_index, edge_weight, params)
    assert jnp.allclose(out, ref, atol=5e-2, rtol=5e-2), (
        "pallas GCN output mismatch vs f32 reference")

    print("KERNEL_OK")
</pallas_src>

<mosaic_0001>
module attributes {stable_mosaic.version = 11 : i64} {
  func.func @_xw_kernel(%arg0: i32, %arg1: memref<64x8xf32, #tpu.memory_space<vmem>>, %arg2: memref<8x128xf32, #tpu.memory_space<vmem>>, %arg3: memref<64x128xbf16, #tpu.memory_space<vmem>>) attributes {dimension_semantics = [#tpu.dimension_semantics<parallel>], iteration_bounds = array<i64: 2>, scalar_prefetch = 0 : i64, scratch_operands = 0 : i64, tpu.core_type = #tpu.core_type<tc>, window_params = [{transform_indices = @transform_0, window_bounds = array<i64: 64, 8>}, {pipeline_mode = #tpu.pipeline_mode<synchronous>, transform_indices = @transform_1, window_bounds = array<i64: 8, 128>}, {transform_indices = @transform_2, window_bounds = array<i64: 64, 128>}]} {
    %c0 = arith.constant 0 : index
    %c0_0 = arith.constant 0 : index
    %0 = vector.load %arg1[%c0, %c0_0] : memref<64x8xf32, #tpu.memory_space<vmem>>, vector<64x8xf32>
    %c0_1 = arith.constant 0 : index
    %c0_2 = arith.constant 0 : index
    %1 = vector.load %arg2[%c0_1, %c0_2] : memref<8x128xf32, #tpu.memory_space<vmem>>, vector<8x128xf32>
    %cst = arith.constant dense<0.000000e+00> : vector<64x128xf32>
    %2 = tpu.matmul %0, %1, %cst {dimension_numbers = #tpu.dot_dimension_numbers<[1], [0], [0], [1], [0, 0, 1, 1], [], []>} : vector<64x8xf32>, vector<8x128xf32>, vector<64x128xf32> -> vector<64x128xf32>
    %3 = arith.truncf %2 : vector<64x128xf32> to vector<64x128xbf16>
    %c0_3 = arith.constant 0 : index
    %c0_4 = arith.constant 0 : index
    %4 = vector.load %arg3[%c0_3, %c0_4] : memref<64x128xbf16, #tpu.memory_space<vmem>>, vector<64x128xbf16>
    tpu.vector_store %arg3[%c0_3, %c0_4], %3 {strides = array<i32>} : memref<64x128xbf16, #tpu.memory_space<vmem>>, vector<64x128xbf16>,
    return
  }
  func.func @transform_0(%arg0: i32) -> (i32, i32) {
    %c0_i32 = arith.constant 0 : i32
    %c0_i32_0 = arith.constant 0 : i32
    return %arg0, %c0_i32 : i32, i32
  }
  func.func @transform_1(%arg0: i32) -> (i32, i32) {
    %c0_i32 = arith.constant 0 : i32
    %c0_i32_0 = arith.constant 0 : i32
    %c0_i32_1 = arith.constant 0 : i32
    return %c0_i32, %c0_i32_0 : i32, i32
  }
  func.func @transform_2(%arg0: i32) -> (i32, i32) {
    %c0_i32 = arith.constant 0 : i32
    %c0_i32_0 = arith.constant 0 : i32
    return %arg0, %c0_i32 : i32, i32
  }
}

</mosaic_0001>

<bundles_post_ra>
// kernel: tpu_custom_call.1
= control target key start
LH: loop header
LB: loop body
LE: loop exit
PB: predicated region body
PF: predicated region fallthrough
CT: control target
= control target key end

     0   :  { %7 = vsyncpa [#allocation3], 0  ;;  %s721_s0 = inlined_call_operand.vmem [shape: f32[128,8], index: 0, kind: input, shape index: {}]   ;;  %s722_s1 = inlined_call_operand.vmem [shape: f32[8,128], index: 1, kind: input, shape index: {}]   ;;  %s723_s2 = inlined_call_operand.hbm [shape: bf16[128,128], index: 2, kind: output, shape index: {}]  }
   0x1   :  { %9 = vsyncpa [#allocation3 + $0x1], 0  ;;  %s608_s9 = smov 0   ;;  %s610_s10 = smov 0  }
   0x2   :  { %s612_s11 = smov 0   ;;  %s614_s12 = smov 0  }
   0x3 LB: > { %s629_s13 = sadd.s32 4294967295, %s588_s12   ;;  %s400_s14 = sadd.s32 4294967294, %s588_s12   ;;  %s588_s12 = sphi %s614_s12, %s729_s12   ;;  %s584_s11 = sphi %s612_s11, %s728_s11   ;;  %s580_s10 = sphi %s610_s10, %s727_s10   ;;  %s576_s9 = sphi %s608_s9, %s726_s9  }
   0x4   : > { %s633_s15 = sadd.s32 1, %s588_s12   ;;  %s69_s16 = sadd.s32 1, %s584_s11 }
   0x5   : > { %s66_s17 = ssub.s32 %s588_s12, %s633_s15  ;;  %p79_p0 = scmp.ne.s32.totalorder %s584_s11, %s580_s10 }
   0x6   : > { %p67_p1 = scmp.eq.s32.totalorder %s66_s17, 0  ;;  %p80_p2 = scmp.eq.s32.totalorder %s629_s13, 1 }
   0x7   : > { %p85_p3 = scmp.ne.s32.totalorder %s580_s10, %s576_s9  ;;  %p86_p4 = scmp.eq.s32.totalorder %s400_s14, 1 }
   0x8   : > { %s644_s18 = scalar_select %p67_p1, %s584_s11, %s69_s16  }
   0x9   : > { %p646_p5 = por %p80_p2, %p79_p0  ;;  %p650_p6 = por %p86_p4, %p85_p3 }
   0xa   : > { %p403_p7 = scmp.ge.s32.totalorder %s588_s12, 1  ;;  %p116_p8 = scmp.lt.s32.totalorder %s588_s12, 3 }
   0xc   : > { %p117_p9 = pnand %p403_p7, %p116_p8 }
   0xd   : > { %v153_v0 = vld [vmem:[%s722_s1] sm:$0xff] (!%p117_p9)  ;;  %s405_s23 = sshll.u32 (!%p117_p9), %s629_s13, 3  ;;  %vm154_vm0 = vcmask (!%p117_p9), 64512   ;;  %s135_s28 = sand.u32 (!%p117_p9), 1, %s580_s10  }
   0xe   : > { %120 = sbr.rel (%p117_p9) target bundleno = 261 (0x105), region = 28  ;;  %469 = vmatprep.subr.mxu0 (!%p117_p9), %v153_v0  ;;  %483 = vmatprep.subr.mxu1 (!%p117_p9), %v153_v0  ;;  %p139_p10 = scmp.lt.s32.totalorder (!%p117_p9), %s405_s23, 15 }
   0xf   : > { %470 = vmatpush3.msra.mxu0 (!%p117_p9), %v153_v0  ;;  %484 = vmatpush3.msra.mxu1 (!%p117_p9), %v153_v0  ;;  %s404_s29 = sshll.u32 (!%p117_p9), %s135_s28, 5  ;;  %s436_s4 = sshll.u32 (!%p117_p9), %s629_s13, 9 }
  0x10   : > { %s137_s30 = scalar_lea.vmem (!%p117_p9), [#allocation2], %s404_s29  ;;  %s678_s7 = scalar_lea.hbm (!%p117_p9), %s723_s2, %s436_s4 }
  0x11   : > { %s338_s3 = sshll.u32 (!%p117_p9), %s137_s30, 4  ;;  %s680_s8 = scalar_lea.sflag (!%p117_p9), [#allocation3], %s135_s28  ;;  %s673_s3 = int_to_ptr.vmem [resolvable:$true] %s338_s3 }
  0x12   : > { %s526_s13 = scalar_lea.vmem (!%p117_p9), %s673_s3, 512  ;;  %s590_s14 = smov (!%p117_p9), [#allocation2]  }
  0x13   : > { %p527_p11 = scmp.ne.s32.totalorder (!%p117_p9), %s673_s3, %s526_s13  ;;  %s530_s16 = sshll.u32 (!%p117_p9), %s590_s14, 4  ;;  %s531_s16 = int_to_ptr.vmem [resolvable:$false] %s530_s16 }
  0x14   : > { %s532_s17 = scalar_lea.vmem (!%p117_p9), %s531_s16, 1024  ;;  %p533_p0 = scmp.lt.s32.totalorder (!%p117_p9), %s673_s3, %s531_s16 }
  0x15   : > { %s731_s23 = smov (!%p139_p10, %s405_s23), 15  ;;  %p528_p12 = pnand %p527_p11, %p646_p5 }
  0x16   : > { %s406_s24 = sshll.u32 %s731_s23, 3  ;;  %p534_p1 = scmp.lt.s32.totalorder %s532_s17, %s526_s13 }
  0x17   : > { %s142_s27 = scalar_lea.vmem %s721_s0, %s406_s24  ;;  %p529_p13 = pneg %p528_p12 }
  0x18   : > { %v145_v1 = vld [vmem:[%s142_s27] sm:$0xff]  ;;  %v146_v3 = vld [vmem:[%s142_s27 + $0x8] sm:$0xff]  ;;  %v147_v5 = vld [vmem:[%s142_s27 + $0x10] sm:$0xff]  ;;  %p535_p2 = por %p534_p1, %p533_p0 }
  0x19   : > { %v149_v2 = vld [vmem:[%s142_s27 + $0x20] sm:$0xff]  ;;  %471 = vmatprep.mubr.msk.f32.mxu0 %vm154_vm0, %v145_v1  ;;  %v150_v4 = vld [vmem:[%s142_s27 + $0x28] sm:$0xff]  ;;  %v151_v6 = vld [vmem:[%s142_s27 + $0x30] sm:$0xff] }
  0x1a   : > { %477 = vmatprep.mubr.msk.f32.mxu1 %vm154_vm0, %v149_v2  ;;  %472 = vmatmul.mubr.msk.f32.vlgmr.msra.gmra.mrb[0].mxu0 %vm154_vm0, %v146_v3  ;;  %v148_v7 = vld [vmem:[%s142_s27 + $0x18] sm:$0xff]  ;;  %p536_p3 = pnand %p535_p2, %p529_p13 }
  0x1b   : > { %478 = vmatmul.mubr.msk.f32.vlgmr.msra.gmra.mrb[0].mxu1 %vm154_vm0, %v150_v4  ;;  %474 = vmatprep.mubr.msk.f32.mxu0 %vm154_vm0, %v147_v5  ;;  %v152_v8 = vld [vmem:[%s142_s27 + $0x38] sm:$0xff] }
  0x1c   : > { %480 = vmatprep.mubr.msk.f32.mxu1 %vm154_vm0, %v151_v6 }
  0x1e   : > { %475 = vmatmul.mubr.msk.f32.gmra.mrb[2].mxu0 %vm154_vm0, %v148_v7 }
  0x1f   : > { %481 = vmatmul.mubr.msk.f32.gmra.mrb[2].mxu1 %vm154_vm0, %v152_v8 }
  0xed   : > { %v473_v9 = vpop.f32.mrb[0].mxu0 }
  0xee   : > { %v479_v10 = vpop.f32.mrb[0].mxu1  ;;  %v245_v11 = vpop.f32.mrb[1].mxu0 }
  0xef   : > { %v265_v12 = vpop.f32.mrb[1].mxu1  ;;  %v440_v13 = vpack.c.bf16 %v473_v9, %v245_v11 }
  0xf0   : > { %v450_v14 = vpack.c.bf16 %v479_v10, %v265_v12 }
  0xf1   : > { %441 = vst [vmem:[%s137_s30] sm:$0xff] %v440_v13   ;;  %v476_v15 = vpop.f32.mrb[2].mxu0 }
  0xf2   : > { %458 = vst [vmem:[%s137_s30 + $0x10] sm:$0xff] %v450_v14   ;;  %v482_v16 = vpop.f32.mrb[2].mxu1  ;;  %v255_v17 = vpop.f32.mrb[3].mxu0 }
  0xf3   : > { %v275_v18 = vpop.f32.mrb[3].mxu1  ;;  %v445_v19 = vpack.c.bf16 %v476_v15, %v255_v17 }
  0xf4   : > { %v455_v20 = vpack.c.bf16 %v482_v16, %v275_v18 }
  0xf5   : > { %457 = vst [vmem:[%s137_s30 + $0x8] sm:$0xff] %v445_v19  }
  0xf6   : > { %459 = vst [vmem:[%s137_s30 + $0x18] sm:$0xff] %v455_v20  }
  0xf7   : > { %539 = shalt.err (!%p536_p3)
}
  0xf8   : > { %s540_s21 = scalar_lea.hbm %s678_s7, 512  ;;  %s544_s24 = scalar_lea.hbm %s723_s2, 1024 }
  0xf9   : > { %p541_p4 = scmp.ne.s32.totalorder %s678_s7, %s540_s21  ;;  %p545_p9 = scmp.lt.u32.totalorder %s678_s7, %s723_s2 }
  0xfa   : > { %p546_p10 = scmp.lt.u32.totalorder %s544_s24, %s540_s21  ;;  %p548_p12 = scmp.lt.u32.totalorder %s540_s21, %s678_s7 }
  0xfb   : > { %p542_p7 = pnand %p541_p4, %p646_p5 }
  0xfc   : > { %p547_p11 = por %p546_p10, %p545_p9 }
  0xfd   : > { %p543_p8 = pneg %p542_p7 }
  0xfe   : > { %p549_p13 = por %p548_p12, %p547_p11 }
 0x100   : > { %p550_p0 = pnand %p549_p13, %p543_p8 }
 0x102   : > { %553 = shalt.err (!%p550_p0)
}
 0x103   : > { %s591_s27 = smov 64   ;;  %s592_s28 = smov 4  }
 0x104   : > { %485 = dma.vmem_to_hbm [thread:$0]  (%p646_p5), %s673_s3, 512, %s678_s7, %s680_s8, %s591_s27, %s591_s27, %s592_s28  }
 0x105 PF: > { %p491_p1 = scmp.ge.s32.totalorder %s588_s12, 2  ;;  %s353_s29 = sand.u32 1, %s576_s9  }
 0x106   : > { %s354_s30 = scalar_lea.sflag [#allocation3], %s353_s29 }
 0x107   : > { %p488_p2 = pnand %p491_p1, %p650_p6 }
 0x109   : > { %571 = dma.done.wait (!%p488_p2), %s354_s30, 512  }
 0x10a   : > { %573 = vsyncadd (!%p488_p2), %s354_s30, 4294966784  ;;  %p12_p3 = scmp.ge.s32.totalorder %s633_s15, 4   ;;  %s726_s9 = smov %s580_s10 }
 0x10b   : > { %s727_s10 = smov %s584_s11  ;;  %s728_s11 = smov %s644_s18 }
 0x10c   : > { %s729_s12 = smov %s633_s15  ;;  %14 = sbr.rel (!%p12_p3) target bundleno = 3 (0x3), region = 63 }
 0x113   :  { %359 = vsyncpa [#allocation3], 1 }
 0x114   :  { %361 = vsyncpa [#allocation3 + $0x1], 1 }

</bundles_post_ra>
